<compile_context>
chip_gen: v6e
topology: v6e:2x2x1
jax: 0.10.0
libtpu: 0.0.40
codegen_flags: <defaults>
</compile_context>

<pallas_src>
import functools

import jax
import jax.numpy as jnp
from jax import lax
from jax.experimental import pallas as pl
from jax.experimental.pallas import tpu as pltpu


def gat_kernel(x_ref, wqkv_ref, bqkv_ref, o_ref, *, bs, n_nodes, hidden):
    x = x_ref[...]                                    # (bs*n, h) fp32
    w = wqkv_ref[...]                                 # (h, 3h), already in->out
    b = bqkv_ref[...]                                 # (1, 3h)

    # Fused K/Q/V projection: one MXU matmul, fp32 accumulate, one bias add.
    qkv = jnp.dot(x, w, preferred_element_type=jnp.float32) + b   # (bs*n, 3h)
    k = qkv[:, :hidden]
    q = qkv[:, hidden:2 * hidden]
    v = qkv[:, 2 * hidden:]

    # Per-batch attention (bs is tiny & static -> unrolled Python loop; all
    # slices are sublane-aligned, n_nodes is a multiple of 8).
    # TODO(synk): for large n_nodes, tile the query axis / use online softmax
    # so the (n, n) scores tile stays within VMEM (mandatory first on v7x).
    for bidx in range(bs):
        r0 = bidx * n_nodes
        qb = q[r0:r0 + n_nodes, :]
        kb = k[r0:r0 + n_nodes, :]
        vb = v[r0:r0 + n_nodes, :]

        # Q @ K^T without materializing a transpose: contract last dims.
        scores = lax.dot_general(
            qb, kb, (((1,), (1,)), ((), ())),
            preferred_element_type=jnp.float32)                   # (n, n)

        # Numerically-stable softmax over the last axis (fp32).
        m = jnp.max(scores, axis=-1, keepdims=True)
        e = jnp.exp(scores - m)
        denom = jnp.sum(e, axis=-1, keepdims=True)
        probs = e * pl.reciprocal(denom, approx=True)             # EUP vrcp

        ob = jnp.dot(probs, vb, preferred_element_type=jnp.float32)   # (n, h)
        o_ref[r0:r0 + n_nodes, :] = jnp.maximum(ob, 0.0).astype(o_ref.dtype)


def gat_operator(x, wk, bk, wq, bq, wv, bv):
    """x: (bs, n_nodes, hidden). Weights in torch Linear convention (out, in)."""
    bs, n_nodes, hidden = x.shape

    # Fuse the three projections: pre-transpose to (in, out) and concat on the
    # output axis -> single (hidden, 3*hidden) weight and (1, 3*hidden) bias.
    w_qkv = jnp.concatenate([wk.T, wq.T, wv.T], axis=1)
    b_qkv = jnp.concatenate([bk, bq, bv]).reshape(1, 3 * hidden)

    # Collapse the batch into the row dim: the projection fills more MXU rows
    # and the whole problem runs in a single grid step (serial-loop overhead
    # removed on v5e/v6e).
    x2 = x.reshape(bs * n_nodes, hidden)

    kernel = functools.partial(gat_kernel, bs=bs, n_nodes=n_nodes, hidden=hidden)

    flops = bs * (6 * n_nodes * hidden * hidden + 4 * n_nodes * n_nodes * hidden)
    transcendentals = bs * n_nodes * n_nodes
    bytes_accessed = 4 * (bs * n_nodes * hidden            # x
                          + hidden * 3 * hidden            # W_qkv
                          + 3 * hidden                     # b_qkv
                          + bs * n_nodes * hidden)         # out

    out2 = pl.pallas_call(
        kernel,
        out_shape=jax.ShapeDtypeStruct((bs * n_nodes, hidden), x.dtype),
        grid_spec=pltpu.PrefetchScalarGridSpec(
            num_scalar_prefetch=0,
            grid=(1,),
            in_specs=[
                pl.BlockSpec((bs * n_nodes, hidden), lambda i: (0, 0)),   # x
                pl.BlockSpec((hidden, 3 * hidden), lambda i: (0, 0)),     # W_qkv
                pl.BlockSpec((1, 3 * hidden), lambda i: (0, 0)),          # b_qkv
            ],
            out_specs=pl.BlockSpec((bs * n_nodes, hidden), lambda i: (0, 0)),
        ),
        compiler_params=pltpu.CompilerParams(
            dimension_semantics=("arbitrary",)),
        cost_estimate=pl.CostEstimate(
            flops=flops,
            transcendentals=transcendentals,
            bytes_accessed=bytes_accessed),
    )(x2, w_qkv, b_qkv)

    return out2.reshape(bs, n_nodes, hidden)


def gat_reference(x, wk, bk, wq, bq, wv, bv):
    key = jnp.einsum("bnh,oh->bno", x, wk) + bk
    query = jnp.einsum("bnh,oh->bno", x, wq) + bq
    value = jnp.einsum("bnh,oh->bno", x, wv) + bv
    scores = jnp.einsum("bqh,bkh->bqk", query, key)
    probs = jax.nn.softmax(scores, axis=-1)
    out = jnp.einsum("bqk,bkh->bqh", probs, value)
    return jax.nn.relu(out)


if __name__ == "__main__":
    bs, n_nodes, hidden = 2, 8, 32

    key = jax.random.PRNGKey(0)
    kx, k1, k2, k3, k4, k5, k6 = jax.random.split(key, 7)

    x = jax.random.normal(kx, (bs, n_nodes, hidden), dtype=jnp.float32)

    # Deterministic parameter init (torch Linear uses U(-1/sqrt(in), 1/sqrt(in)))
    bound = 1.0 / jnp.sqrt(hidden)
    wk = jax.random.uniform(k1, (hidden, hidden), jnp.float32, -bound, bound)
    bk = jax.random.uniform(k2, (hidden,), jnp.float32, -bound, bound)
    wq = jax.random.uniform(k3, (hidden, hidden), jnp.float32, -bound, bound)
    bq = jax.random.uniform(k4, (hidden,), jnp.float32, -bound, bound)
    wv = jax.random.uniform(k5, (hidden, hidden), jnp.float32, -bound, bound)
    bv = jax.random.uniform(k6, (hidden,), jnp.float32, -bound, bound)

    out = gat_operator(x, wk, bk, wq, bq, wv, bv)
    out = jax.block_until_ready(out)

    ref = gat_reference(x, wk, bk, wq, bq, wv, bv)
    assert out.shape == (bs, n_nodes, hidden)
    # Tolerance slightly looser than before because the softmax denominator now
    # uses the approximate EUP reciprocal (per perf review).
    assert jnp.allclose(out, ref, atol=2e-3, rtol=2e-3), "mismatch vs reference"

    print("KERNEL_OK")
</pallas_src>

<mosaic_0001>
module attributes {stable_mosaic.version = 11 : i64} {
  func.func @gat_kernel(%arg0: i32, %arg1: memref<16x32xf32, #tpu.memory_space<vmem>>, %arg2: memref<32x96xf32, #tpu.memory_space<vmem>>, %arg3: memref<1x96xf32, #tpu.memory_space<vmem>>, %arg4: memref<16x32xf32, #tpu.memory_space<vmem>>) attributes {dimension_semantics = [#tpu.dimension_semantics<arbitrary>], iteration_bounds = array<i64: 1>, scalar_prefetch = 0 : i64, scratch_operands = 0 : i64, tpu.core_type = #tpu.core_type<tc>, window_params = [{pipeline_mode = #tpu.pipeline_mode<synchronous>, transform_indices = @transform_0, window_bounds = array<i64: 16, 32>}, {pipeline_mode = #tpu.pipeline_mode<synchronous>, transform_indices = @transform_1, window_bounds = array<i64: 32, 96>}, {pipeline_mode = #tpu.pipeline_mode<synchronous>, transform_indices = @transform_2, window_bounds = array<i64: 1, 96>}, {pipeline_mode = #tpu.pipeline_mode<synchronous>, transform_indices = @transform_3, window_bounds = array<i64: 16, 32>}]} {
    %c0 = arith.constant 0 : index
    %c0_0 = arith.constant 0 : index
    %0 = vector.load %arg1[%c0, %c0_0] : memref<16x32xf32, #tpu.memory_space<vmem>>, vector<16x32xf32>
    %c0_1 = arith.constant 0 : index
    %c0_2 = arith.constant 0 : index
    %1 = vector.load %arg2[%c0_1, %c0_2] : memref<32x96xf32, #tpu.memory_space<vmem>>, vector<32x96xf32>
    %c0_3 = arith.constant 0 : index
    %c0_4 = arith.constant 0 : index
    %2 = vector.load %arg3[%c0_3, %c0_4] : memref<1x96xf32, #tpu.memory_space<vmem>>, vector<1x96xf32>
    %cst = arith.constant dense<0.000000e+00> : vector<16x96xf32>
    %3 = tpu.matmul %0, %1, %cst {dimension_numbers = #tpu.dot_dimension_numbers<[1], [0], [0], [1], [0, 0, 1, 1], [], []>} : vector<16x32xf32>, vector<32x96xf32>, vector<16x96xf32> -> vector<16x96xf32>
    %4 = vector.broadcast %2 : vector<1x96xf32> to vector<16x96xf32>
    %5 = arith.addf %3, %4 : vector<16x96xf32>
    %6 = vector.extract_strided_slice %5 {offsets = [0, 0], sizes = [16, 32], strides = [1, 1]} : vector<16x96xf32> to vector<16x32xf32>
    %7 = vector.extract_strided_slice %5 {offsets = [0, 32], sizes = [16, 32], strides = [1, 1]} : vector<16x96xf32> to vector<16x32xf32>
    %8 = vector.extract_strided_slice %5 {offsets = [0, 64], sizes = [16, 32], strides = [1, 1]} : vector<16x96xf32> to vector<16x32xf32>
    %9 = vector.extract_strided_slice %7 {offsets = [0, 0], sizes = [8, 32], strides = [1, 1]} : vector<16x32xf32> to vector<8x32xf32>
    %10 = vector.extract_strided_slice %6 {offsets = [0, 0], sizes = [8, 32], strides = [1, 1]} : vector<16x32xf32> to vector<8x32xf32>
    %11 = vector.extract_strided_slice %8 {offsets = [0, 0], sizes = [8, 32], strides = [1, 1]} : vector<16x32xf32> to vector<8x32xf32>
    %cst_5 = arith.constant dense<0.000000e+00> : vector<8x8xf32>
    %12 = tpu.matmul %9, %10, %cst_5 {dimension_numbers = #tpu.dot_dimension_numbers<[1], [1], [0], [0], [0, 0, 1, 0], [], []>} : vector<8x32xf32>, vector<8x32xf32>, vector<8x8xf32> -> vector<8x8xf32>
    %cst_6 = arith.constant dense<0xFF800000> : vector<8xf32>
    %13 = vector.multi_reduction <maximumf>, %12, %cst_6 [1] : vector<8x8xf32> to vector<8xf32>
    %14 = vector.shape_cast %13 : vector<8xf32> to vector<8x1xf32>
    %15 = vector.broadcast %14 : vector<8x1xf32> to vector<8x8xf32>
    %16 = arith.subf %12, %15 : vector<8x8xf32>
    %17 = math.exp %16 : vector<8x8xf32>
    %cst_7 = arith.constant dense<0.000000e+00> : vector<8xf32>
    %18 = vector.multi_reduction <add>, %17, %cst_7 [1] : vector<8x8xf32> to vector<8xf32>
    %19 = vector.shape_cast %18 : vector<8xf32> to vector<8x1xf32>
    %20 = tpu.reciprocal %19 {approx = true} : vector<8x1xf32> -> vector<8x1xf32>
    %21 = vector.broadcast %20 : vector<8x1xf32> to vector<8x8xf32>
    %22 = arith.mulf %17, %21 : vector<8x8xf32>
    %cst_8 = arith.constant dense<0.000000e+00> : vector<8x32xf32>
    %23 = tpu.matmul %22, %11, %cst_8 {dimension_numbers = #tpu.dot_dimension_numbers<[1], [0], [0], [1], [0, 0, 1, 1], [], []>} : vector<8x8xf32>, vector<8x32xf32>, vector<8x32xf32> -> vector<8x32xf32>
    %cst_9 = arith.constant 0.000000e+00 : f32
    %24 = vector.broadcast %cst_9 : f32 to vector<8x32xf32>
    %25 = arith.maximumf %23, %24 : vector<8x32xf32>
    %c0_10 = arith.constant 0 : index
    %c0_11 = arith.constant 0 : index
    %26 = vector.load %arg4[%c0_10, %c0_11] : memref<16x32xf32, #tpu.memory_space<vmem>>, vector<8x32xf32>
    tpu.vector_store %arg4[%c0_10, %c0_11], %25 {strides = array<i32>} : memref<16x32xf32, #tpu.memory_space<vmem>>, vector<8x32xf32>,
    %27 = vector.extract_strided_slice %7 {offsets = [8, 0], sizes = [8, 32], strides = [1, 1]} : vector<16x32xf32> to vector<8x32xf32>
    %28 = vector.extract_strided_slice %6 {offsets = [8, 0], sizes = [8, 32], strides = [1, 1]} : vector<16x32xf32> to vector<8x32xf32>
    %29 = vector.extract_strided_slice %8 {offsets = [8, 0], sizes = [8, 32], strides = [1, 1]} : vector<16x32xf32> to vector<8x32xf32>
    %cst_12 = arith.constant dense<0.000000e+00> : vector<8x8xf32>
    %30 = tpu.matmul %27, %28, %cst_12 {dimension_numbers = #tpu.dot_dimension_numbers<[1], [1], [0], [0], [0, 0, 1, 0], [], []>} : vector<8x32xf32>, vector<8x32xf32>, vector<8x8xf32> -> vector<8x8xf32>
    %cst_13 = arith.constant dense<0xFF800000> : vector<8xf32>
    %31 = vector.multi_reduction <maximumf>, %30, %cst_13 [1] : vector<8x8xf32> to vector<8xf32>
    %32 = vector.shape_cast %31 : vector<8xf32> to vector<8x1xf32>
    %33 = vector.broadcast %32 : vector<8x1xf32> to vector<8x8xf32>
    %34 = arith.subf %30, %33 : vector<8x8xf32>
    %35 = math.exp %34 : vector<8x8xf32>
    %cst_14 = arith.constant dense<0.000000e+00> : vector<8xf32>
    %36 = vector.multi_reduction <add>, %35, %cst_14 [1] : vector<8x8xf32> to vector<8xf32>
    %37 = vector.shape_cast %36 : vector<8xf32> to vector<8x1xf32>
    %38 = tpu.reciprocal %37 {approx = true} : vector<8x1xf32> -> vector<8x1xf32>
    %39 = vector.broadcast %38 : vector<8x1xf32> to vector<8x8xf32>
    %40 = arith.mulf %35, %39 : vector<8x8xf32>
    %cst_15 = arith.constant dense<0.000000e+00> : vector<8x32xf32>
    %41 = tpu.matmul %40, %29, %cst_15 {dimension_numbers = #tpu.dot_dimension_numbers<[1], [0], [0], [1], [0, 0, 1, 1], [], []>} : vector<8x8xf32>, vector<8x32xf32>, vector<8x32xf32> -> vector<8x32xf32>
    %cst_16 = arith.constant 0.000000e+00 : f32
    %42 = vector.broadcast %cst_16 : f32 to vector<8x32xf32>
    %43 = arith.maximumf %41, %42 : vector<8x32xf32>
    %c8 = arith.constant 8 : index
    %c0_17 = arith.constant 0 : index
    %44 = vector.load %arg4[%c8, %c0_17] : memref<16x32xf32, #tpu.memory_space<vmem>>, vector<8x32xf32>
    tpu.vector_store %arg4[%c8, %c0_17], %43 {strides = array<i32>} : memref<16x32xf32, #tpu.memory_space<vmem>>, vector<8x32xf32>,
    return
  }
  func.func @transform_0(%arg0: i32) -> (i32, i32) {
    %c0_i32 = arith.constant 0 : i32
    %c0_i32_0 = arith.constant 0 : i32
    %c0_i32_1 = arith.constant 0 : i32
    return %c0_i32, %c0_i32_0 : i32, i32
  }
  func.func @transform_1(%arg0: i32) -> (i32, i32) {
    %c0_i32 = arith.constant 0 : i32
    %c0_i32_0 = arith.constant 0 : i32
    %c0_i32_1 = arith.constant 0 : i32
    return %c0_i32, %c0_i32_0 : i32, i32
  }
  func.func @transform_2(%arg0: i32) -> (i32, i32) {
    %c0_i32 = arith.constant 0 : i32
    %c0_i32_0 = arith.constant 0 : i32
    %c0_i32_1 = arith.constant 0 : i32
    return %c0_i32, %c0_i32_0 : i32, i32
  }
  func.func @transform_3(%arg0: i32) -> (i32, i32) {
    %c0_i32 = arith.constant 0 : i32
    %c0_i32_0 = arith.constant 0 : i32
    %c0_i32_1 = arith.constant 0 : i32
    return %c0_i32, %c0_i32_0 : i32, i32
  }
}

</mosaic_0001>

<bundles_post_ra>
// kernel: tpu_custom_call.1
= control target key start
LH: loop header
LB: loop body
LE: loop exit
PB: predicated region body
PF: predicated region fallthrough
CT: control target
= control target key end

     0   :  { %8 = vsyncpa [#allocation3], 0  ;;  %s694_s0 = inlined_call_operand.hbm [shape: f32[16,32], index: 0, kind: input, shape index: {}]   ;;  %s695_s1 = inlined_call_operand.hbm [shape: f32[32,96], index: 1, kind: input, shape index: {}]   ;;  %s696_s2 = inlined_call_operand.vmem [shape: f32[1,96], index: 2, kind: input, shape index: {}]   ;;  %s697_s3 = inlined_call_operand.hbm [shape: f32[16,32], index: 3, kind: output, shape index: {}]  }
   0x1   :  { %9 = vsyncpa [#allocation6], 0 }
   0x2   :  { %10 = vsyncpa [#allocation4], 0  ;;  %s626_s12 = smov [#allocation2]  }
   0x3   :  { %s16_s13 = sshll.u32 %s626_s12, 4  ;;  %s17_s13 = int_to_ptr.vmem [resolvable:$true] %s16_s13 }
   0x4   :  { %s568_s14 = scalar_lea.vmem %s17_s13, 256  ;;  %p573_p1 = scmp.lt.s32.totalorder %s17_s13, %s17_s13 }
   0x5   :  { %p569_p0 = scmp.ne.s32.totalorder %s17_s13, %s568_s14  ;;  %p574_p2 = scmp.lt.s32.totalorder %s568_s14, %s568_s14 }
   0x7   :  { %p575_p3 = por %p574_p2, %p573_p1 }
   0x9   :  { %p576_p4 = pnand %p575_p3, %p569_p0 }
   0xb   :  { %579 = shalt.err (!%p576_p4)
}
   0xc   :  { %s627_s15 = smov 128   ;;  %s628_s16 = smov 8  }
   0xd   :  { %22 = dma.hbm_to_vmem [thread:$0]  %s694_s0, 256, %s17_s13, [#allocation3], %s627_s15, %s627_s15, %s628_s16  }
   0xe   :  { %s629_s19 = smov [#allocation5]  }
   0xf   :  { %s28_s20 = sshll.u32 %s629_s19, 4  ;;  %s29_s20 = int_to_ptr.vmem [resolvable:$true] %s28_s20 }
  0x10   :  { %s588_s21 = scalar_lea.vmem %s29_s20, 512  ;;  %p593_p6 = scmp.lt.s32.totalorder %s29_s20, %s29_s20 }
  0x11   :  { %p589_p5 = scmp.ne.s32.totalorder %s29_s20, %s588_s21  ;;  %p594_p7 = scmp.lt.s32.totalorder %s588_s21, %s588_s21 }
  0x13   :  { %p595_p8 = por %p594_p7, %p593_p6 }
  0x15   :  { %p596_p9 = pnand %p595_p8, %p589_p5 }
  0x17   :  { %599 = shalt.err (!%p596_p9)
}
  0x18   :  { %34 = dma.hbm_to_vmem [thread:$0]  %s695_s1, 512, %s29_s20, [#allocation6], %s627_s15, %s627_s15, %s628_s16  }
  0x19   :  { %620 = dma.done.wait [#allocation3], 256  }
  0x1a   :  { %621 = vsyncadd [#allocation3], 4294967040 }
  0x1b   :  { %622 = dma.done.wait [#allocation6], 512  }
  0x1c   :  { %623 = vsyncadd [#allocation6], 4294966784  ;;  %vm56_vm0 = vcmask 261120   ;;  %v48_v0 = vld [vmem:[#allocation5 + $0x18] sm:$0xff]  ;;  %v47_v1 = vld [vmem:[#allocation5 + $0x10] sm:$0xff]  ;;  %v630_v6 = vmov 0.0  }
  0x1d   :  { %512 = vmatprep.subr.mxu0 %v48_v0  ;;  %v43_v2 = vld [vmem:[#allocation2] sm:$0xff]  ;;  %v46_v3 = vld [vmem:[#allocation5 + $0x8] sm:$0xff]  ;;  %v45_v4 = vld [vmem:[#allocation5] sm:$0xff]  ;;  %523 = vmatprep.subr.mxu1 %v630_v6  ;;  %vm631_vm1 = vmmov 0   ;;  %s632_s24 = smov 96   ;;  %vm215_vm2 = vcmask 64512  }
  0x1e   :  { %513 = vmatpush3.msra.mxu0 %v48_v0  ;;  %520 = vmatprep.mubr.msk.f32.mxu0 %vm56_vm0, %v43_v2  ;;  %v44_v5 = vld [vmem:[#allocation2 + $0x8] sm:$0xff]  ;;  %v489_v7 = vld [vmem:[%s696_s2] ss:$0 sm:$0xff]  ;;  %s633_s2 = smov 64   ;;  %s634_s25 = smov [#allocation7]  }
  0x1f   :  { %514 = vmatprep.subr.mxu0 %v47_v1  ;;  %525 = vmatprep.mubr.msk.f32.mxu1 %vm631_vm1, %v630_v6  ;;  %s476_s26 = sshll.u32 %s634_s25, 4  ;;  %s477_s26 = int_to_ptr.vmem [resolvable:$true] %s476_s26 }
  0x20   :  { %515 = vmatpush3.msra.mxu0 %v47_v1  ;;  %s600_s27 = scalar_lea.vmem %s477_s26, 256  ;;  %p605_p11 = scmp.lt.s32.totalorder %s477_s26, %s477_s26 }
  0x21   :  { %516 = vmatprep.subr.mxu0 %v46_v3  ;;  %p601_p10 = scmp.ne.s32.totalorder %s477_s26, %s600_s27  ;;  %p606_p12 = scmp.lt.s32.totalorder %s600_s27, %s600_s27 }
  0x22   :  { %517 = vmatpush3.msra.mxu0 %v46_v3 }
  0x23   :  { %518 = vmatprep.subr.mxu0 %v45_v4  ;;  %p607_p13 = por %p606_p12, %p605_p11 }
  0x24   :  { %519 = vmatpush3.msra.mxu0 %v45_v4 }
  0x25   :  { %521 = vmatmul.mubr.msk.f32.vlgmr.msra.gmra.mxu0 %vm56_vm0, %v44_v5  ;;  %533 = vmatprep.subr.mxu0 %v630_v6  ;;  %p608_p0 = pnand %p607_p13, %p601_p10 }
  0x26   :  { %535 = vmatprep.mubr.msk.f32.mxu0 %vm631_vm1, %v630_v6 }
  0xe5   :  { %v522_v8 = vpop.f32.mrf.mxu0 }
  0xe6   :  { %v135_v9 = vadd.f32 %v522_v8, %v489_v7 }
  0xe7   :  { %v129_v10 = vpop.f32.mrf.mxu0 }
  0xe8   :  { %v130_v11 = vadd.f32 %v489_v7, %v129_v10  ;;  %534 = vmatpush3.xpose.msk.msra.mxu0 %vm56_vm0, %v135_v9 }
  0xea   :  { %139 = vrot.lane.b32.xlu0 %v130_v11, %s632_s24  ;;  %524 = vmatpush3.xpose.msk.msra.mxu1 %vm56_vm0, %v130_v11 }
  0xeb   :  { %528 = vmatprep.subr.mxu1 %v630_v6 }
  0xee   :  { %306 = vrot.lane.b32.xlu0 %v135_v9, %s632_s24 }
 0x15c   :  { %v140_v12 = vpop.permute.xlu0 %139 }
 0x15d   :  { %526 = vmatmul.mubr.msk.f32.vlgmr.msra.gmra.mxu1 %vm56_vm0, %v140_v12 }
 0x15e   :  { %530 = vmatprep.mubr.msk.f32.mxu1 %vm631_vm1, %v630_v6 }
 0x160   :  { %v307_v13 = vpop.permute.xlu0 %306 }
 0x161   :  { %536 = vmatmul.mubr.msk.f32.vlgmr.msra.gmra.mxu0 %vm56_vm0, %v307_v13 }
 0x21d   :  { %v211_v14 = vpop.f32.mrf.mxu1 }
 0x21e   :  { %v216_v15 = vsel %vm215_vm2, %v211_v14, -inf }
 0x21f   :  { %217 = vmax.xlane.f32.xlu1 %v216_v15  ;;  %v527_v16 = vpop.f32.mrf.mxu1 }
 0x221   :  { %v378_v17 = vpop.f32.mrf.mxu0 }
 0x222   :  { %v382_v18 = vsel %vm215_vm2, %v378_v17, -inf }
 0x223   :  { %v537_v19 = vpop.f32.mrf.mxu0  ;;  %383 = vmax.xlane.f32.xlu1 %v382_v18 }
 0x2a8   :  { %v218_v20 = vpop.xlane.xlu1 %217 }
 0x2a9   :  { %v219_v21 = vsub.f32 %v211_v14, %v218_v20 }
 0x2ab   :  { %v220_v22 = vmul.f32 1.442695, %v219_v21 }
 0x2ac   :  { %v384_v23 = vpop.xlane.xlu1 %383 }
 0x2ad   :  { %552 = vpow2.f32 %v220_v22  ;;  %v385_v24 = vsub.f32 %v378_v17, %v384_v23 }
 0x2af   :  { %v386_v25 = vmul.f32 1.442695, %v385_v24 }
 0x2b1   :  { %554 = vpow2.f32 %v386_v25 }
 0x2ba   :  { %v553_v26 = vpop.eup %552 }
 0x2bb   :  { %v222_v27 = vsel %vm215_vm2, %v553_v26, 0.0 }
 0x2bc   :  { %223 = vadd.xlane.f32.xlu0 %v222_v27 }
 0x2be   :  { %v555_v28 = vpop.eup %554 }
 0x2bf   :  { %v388_v29 = vsel %vm215_vm2, %v555_v28, 0.0 }
 0x2c0   :  { %389 = vadd.xlane.f32.xlu1 %v388_v29 }
 0x2d1   :  { %227 = vrot.lane.b32.xlu1 %v130_v11, %s633_s2 }
 0x2d5   :  { %393 = vrot.lane.b32.xlu1 %v135_v9, %s633_s2 }
 0x345   :  { %v224_v30 = vpop.xlane.xlu0 %223 }
 0x346   :  { %556 = vrcp.f32 %v224_v30 }
 0x349   :  { %v390_v31 = vpop.xlane.xlu1 %389 }
 0x34a   :  { %558 = vrcp.f32 %v390_v31 }
 0x34d   :  { %v228_v32 = vpop.permute.xlu1 %227 }
 0x34e   :  { %529 = vmatpush3.msra.mxu1 %v228_v32 }
 0x34f   :  { %538 = vmatprep.subr.mxu1 %v630_v6 }
 0x351   :  { %v394_v35 = vpop.permute.xlu1 %393 }
 0x353   :  { %v557_v33 = vpop.eup %556 }
 0x354   :  { %v226_v34 = vmul.f32 %v557_v33, %v553_v26 }
 0x356   :  { %531 = vmatmul.mubr.msk.f32.vlgmr.msra.gmra.mxu1 %vm215_vm2, %v226_v34 }
 0x357   :  { %v559_v36 = vpop.eup %558  ;;  %539 = vmatpush3.msra.mxu1 %v394_v35  ;;  %540 = vmatprep.mubr.msk.f32.mxu1 %vm631_vm1, %v630_v6 }
 0x358   :  { %v392_v37 = vmul.f32 %v559_v36, %v555_v28 }
 0x35a   :  { %541 = vmatmul.mubr.msk.f32.vlgmr.msra.gmra.mxu1 %vm215_vm2, %v392_v37 }
 0x416   :  { %v299_v38 = vpop.f32.mrf.mxu1 }
 0x417   :  { %v303_v39 = vmax.f32 %v299_v38, 0.0 }
 0x418   :  { %v532_v40 = vpop.f32.mrf.mxu1 }
 0x419   :  { %304 = vst.msk [vmem:[#allocation7] sm:$0xff] %vm56_vm0, %v303_v39 }
 0x41a   :  { %v465_v41 = vpop.f32.mrf.mxu1 }
 0x41b   :  { %v469_v42 = vmax.f32 %v465_v41, 0.0 }
 0x41c   :  { %v542_v43 = vpop.f32.mrf.mxu1 }
 0x41d   :  { %470 = vst.msk [vmem:[#allocation7 + $0x8] sm:$0xff] %vm56_vm0, %v469_v42 }
 0x41e   :  { %611 = shalt.err (!%p608_p0)
}
 0x41f   :  { %482 = dma.vmem_to_hbm [thread:$0]  %s477_s26, 256, %s697_s3, [#allocation4], %s627_s15, %s627_s15, %s628_s16  }
 0x420   :  { %624 = dma.done.wait [#allocation4], 256  }
 0x421   :  { %625 = vsyncadd [#allocation4], 4294967040 }
 0x422   :  { %486 = vsyncpa [#allocation3], 1 }
 0x423   :  { %487 = vsyncpa [#allocation6], 1 }
 0x424   :  { %488 = vsyncpa [#allocation4], 1 }

</bundles_post_ra>
